<compile_context>
chip_gen: v5e
topology: v5e:2x2
jax: 0.10.0
libtpu: 0.0.40
codegen_flags: <defaults>
</compile_context>

<pallas_src>
import functools

import jax
import jax.numpy as jnp
from jax.experimental import pallas as pl
from jax.experimental.pallas import tpu as pltpu


def _round_up(x, m):
    return (x + m - 1) // m * m


# ----------------------------- Pallas kernel --------------------------------
def _fused_q_kernel(h1p, h2p, outp,
                    xu_ref, w1_ref, w2_ref, w3_ref, bias_ref, out_ref):
    # Layer 1: single fused matmul on the concatenated (state, action) tile.
    h = jnp.dot(xu_ref[...], w1_ref[...], preferred_element_type=jnp.float32)
    h = jnp.maximum(h + bias_ref[0:1, :h1p], 0.0)          # bias + ReLU

    # Layer 2: block-diagonal fused hidden layer (head1 | head2).
    h = jnp.dot(h.astype(w2_ref.dtype), w2_ref[...],
                preferred_element_type=jnp.float32)
    h = jnp.maximum(h + bias_ref[1:2, :h2p], 0.0)          # bias + ReLU

    # Layer 3: narrow (8-lane) output; lane 0 = q1, lane 1 = q2, rest zeros.
    out = jnp.dot(h.astype(w3_ref.dtype), w3_ref[...],
                  preferred_element_type=jnp.float32)
    out_ref[...] = out + bias_ref[2:3, :outp]


# --------------------------- parameter packing -------------------------------
def pack_qnetwork_params(params1, params2, num_inputs, num_actions):
    """Fuse the two Q heads into block-diagonal, lane-padded matrices.

    params*: [w1, b1, w2, b2, w3, b3] with weights stored [in, out]
             (transpose of nn.Linear.weight) and biases [1, out].
    Assumes the standard SAC 2-hidden-layer MLP shape.

    Correctness invariants:
      (a) all padded lanes of W*/bias are exact zeros (ReLU keeps padded
          activations at exactly 0);
      (b) padded batch rows produce garbage that the wrapper discards.
    """
    assert len(params1) == 6 and len(params2) == 6, "expects 2 hidden layers"
    w1a, b1a, w2a, b2a, w3a, b3a = params1
    w1b, b1b, w2b, b2b, w3b, b3b = params2
    d_in = num_inputs + num_actions
    h1 = w1a.shape[1]
    h2 = w2a.shape[1]

    H1P = _round_up(2 * h1, 128)
    H2P = _round_up(2 * h2, 128)
    OUTP = 8                       # last dim == full array dim -> legal block
    WMAX = max(H1P, H2P)

    # Layer 1: column-concat of both heads, zero-padded to H1P lanes.
    W1 = jnp.zeros((d_in, H1P), jnp.float32)
    W1 = W1.at[:, :h1].set(w1a).at[:, h1:2 * h1].set(w1b)

    # Layer 2: block-diagonal, zero-padded.
    W2 = jnp.zeros((H1P, H2P), jnp.float32)
    W2 = W2.at[:h1, :h2].set(w2a).at[h1:2 * h1, h2:2 * h2].set(w2b)

    # Layer 3: head 1 -> lane 0, head 2 -> lane 1, only 8 output lanes total
    # so the HBM writeback is 32 B/row instead of 512 B/row.
    W3 = jnp.zeros((H2P, OUTP), jnp.float32)
    W3 = W3.at[:h2, 0:1].set(w3a).at[h2:2 * h2, 1:2].set(w3b)

    # Bias slab: one [3, WMAX] array -> one DMA instead of three.
    bias = jnp.zeros((3, WMAX), jnp.float32)
    bias = bias.at[0, :h1].set(b1a.reshape(-1)).at[0, h1:2 * h1].set(b1b.reshape(-1))
    bias = bias.at[1, :h2].set(b2a.reshape(-1)).at[1, h2:2 * h2].set(b2b.reshape(-1))
    bias = bias.at[2, 0:1].set(b3a.reshape(-1)).at[2, 1:2].set(b3b.reshape(-1))

    return W1, W2, W3, bias, (H1P, H2P, OUTP)


# ------------------------------ Python wrapper -------------------------------
def make_qnetwork_forward(params1, params2, num_inputs, num_actions, *,
                          block_batch=1024, use_bf16=False):
    """Pack the twin-Q parameters once and return a jitted forward(state, action)."""
    W1, W2, W3, bias, (H1P, H2P, OUTP) = pack_qnetwork_params(
        params1, params2, num_inputs, num_actions)

    compute_dtype = jnp.bfloat16 if use_bf16 else jnp.float32
    W1 = W1.astype(compute_dtype)
    W2 = W2.astype(compute_dtype)
    W3 = W3.astype(compute_dtype)
    d_in = num_inputs + num_actions
    kernel = functools.partial(_fused_q_kernel, H1P, H2P, OUTP)

    @jax.jit
    def forward(state, action):
        B = state.shape[0]
        xu = jnp.concatenate(
            [state.astype(compute_dtype), action.astype(compute_dtype)], axis=1)

        # Batch tiling: minimize pad waste; produce >= 2 grid steps at large
        # batch so v7x can shard the "parallel" axis across its 2 TensorCores.
        nblk = max(1, pl.cdiv(B, block_batch))
        if nblk == 1 and B >= 256:
            nblk = 2
        bm = _round_up(max(1, pl.cdiv(B, nblk)), 8)
        Bp = bm * nblk
        if Bp != B:
            xu = jnp.pad(xu, ((0, Bp - B), (0, 0)))

        out = pl.pallas_call(
            kernel,
            out_shape=jax.ShapeDtypeStruct((Bp, OUTP), jnp.float32),
            grid=(nblk,),
            in_specs=[
                pl.BlockSpec((bm, d_in), lambda i: (i, 0)),   # activation tile
                pl.BlockSpec(W1.shape, lambda i: (0, 0)),     # resident weights
                pl.BlockSpec(W2.shape, lambda i: (0, 0)),
                pl.BlockSpec(W3.shape, lambda i: (0, 0)),
                pl.BlockSpec(bias.shape, lambda i: (0, 0)),   # packed bias slab
            ],
            out_specs=pl.BlockSpec((bm, OUTP), lambda i: (i, 0)),
            compiler_params=pltpu.CompilerParams(
                dimension_semantics=("parallel",)),
        )(xu, W1, W2, W3, bias)

        q = out[:B]
        return q[:, 0:1], q[:, 1:2]

    return forward


# --------------------------- deterministic init -------------------------------
def xavier_uniform(key, fan_in, fan_out):
    # torch.nn.init.xavier_uniform_ with gain=1: U(-a, a), a = sqrt(6/(fan_in+fan_out))
    a = (6.0 / (fan_in + fan_out)) ** 0.5
    return jax.random.uniform(key, (fan_in, fan_out), jnp.float32, -a, a)


def init_mlp_params(key, sizes):
    """mlp([d_in] + hidden_sizes + [1]) with xavier_uniform weights, zero biases."""
    params = []
    keys = jax.random.split(key, len(sizes) - 1)
    for j in range(len(sizes) - 1):
        w = xavier_uniform(keys[j], sizes[j], sizes[j + 1])   # stored [in, out]
        b = jnp.zeros((1, sizes[j + 1]), jnp.float32)
        params += [w, b]
    return params


# ----------------------------------- main -------------------------------------
if __name__ == "__main__":
    # Small shapes consistent with the module.
    batch = 8
    num_inputs = 12
    num_actions = 4
    hidden_sizes = (32, 32)   # activation == ReLU

    key = jax.random.PRNGKey(0)
    k_state, k_action, k_q1, k_q2 = jax.random.split(key, 4)

    state = jax.random.normal(k_state, (batch, num_inputs), jnp.float32)
    action = jax.random.normal(k_action, (batch, num_actions), jnp.float32)

    sizes = [num_inputs + num_actions] + list(hidden_sizes) + [1]
    params_q1 = init_mlp_params(k_q1, sizes)
    params_q2 = init_mlp_params(k_q2, sizes)

    forward = make_qnetwork_forward(params_q1, params_q2, num_inputs, num_actions)
    q1, q2 = forward(state, action)
    jax.block_until_ready((q1, q2))

    # Cross-check against a pure-JAX reference of the original (unfused) math.
    def ref_mlp(xu, p):
        w1, b1, w2, b2, w3, b3 = p
        h = jnp.maximum(xu @ w1 + b1, 0.0)
        h = jnp.maximum(h @ w2 + b2, 0.0)
        return h @ w3 + b3

    xu = jnp.concatenate([state, action], axis=1)
    ref_q1 = ref_mlp(xu, params_q1)
    ref_q2 = ref_mlp(xu, params_q2)
    assert q1.shape == (batch, 1) and q2.shape == (batch, 1)
    assert jnp.allclose(q1, ref_q1, atol=1e-4, rtol=1e-4)
    assert jnp.allclose(q2, ref_q2, atol=1e-4, rtol=1e-4)

    print("KERNEL_OK")
</pallas_src>

<mosaic_0001>
module attributes {stable_mosaic.version = 11 : i64} {
  func.func @_fused_q_kernel(%arg0: i32, %arg1: memref<8x16xf32, #tpu.memory_space<vmem>>, %arg2: memref<16x128xf32, #tpu.memory_space<vmem>>, %arg3: memref<128x128xf32, #tpu.memory_space<vmem>>, %arg4: memref<128x8xf32, #tpu.memory_space<vmem>>, %arg5: memref<3x128xf32, #tpu.memory_space<vmem>>, %arg6: memref<8x8xf32, #tpu.memory_space<vmem>>) attributes {dimension_semantics = [#tpu.dimension_semantics<parallel>], iteration_bounds = array<i64: 1>, scalar_prefetch = 0 : i64, scratch_operands = 0 : i64, tpu.core_type = #tpu.core_type<tc>, window_params = [{transform_indices = @transform_0, window_bounds = array<i64: 8, 16>}, {pipeline_mode = #tpu.pipeline_mode<synchronous>, transform_indices = @transform_1, window_bounds = array<i64: 16, 128>}, {pipeline_mode = #tpu.pipeline_mode<synchronous>, transform_indices = @transform_2, window_bounds = array<i64: 128, 128>}, {pipeline_mode = #tpu.pipeline_mode<synchronous>, transform_indices = @transform_3, window_bounds = array<i64: 128, 8>}, {pipeline_mode = #tpu.pipeline_mode<synchronous>, transform_indices = @transform_4, window_bounds = array<i64: 3, 128>}, {transform_indices = @transform_5, window_bounds = array<i64: 8, 8>}]} {
    %c0 = arith.constant 0 : index
    %c0_0 = arith.constant 0 : index
    %0 = vector.load %arg1[%c0, %c0_0] : memref<8x16xf32, #tpu.memory_space<vmem>>, vector<8x16xf32>
    %c0_1 = arith.constant 0 : index
    %c0_2 = arith.constant 0 : index
    %1 = vector.load %arg2[%c0_1, %c0_2] : memref<16x128xf32, #tpu.memory_space<vmem>>, vector<16x128xf32>
    %cst = arith.constant dense<0.000000e+00> : vector<8x128xf32>
    %2 = tpu.matmul %0, %1, %cst {dimension_numbers = #tpu.dot_dimension_numbers<[1], [0], [0], [1], [0, 0, 1, 1], [], []>} : vector<8x16xf32>, vector<16x128xf32>, vector<8x128xf32> -> vector<8x128xf32>
    %c0_3 = arith.constant 0 : index
    %c0_4 = arith.constant 0 : index
    %3 = vector.load %arg5[%c0_3, %c0_4] : memref<3x128xf32, #tpu.memory_space<vmem>>, vector<1x128xf32>
    %4 = vector.broadcast %3 : vector<1x128xf32> to vector<8x128xf32>
    %5 = arith.addf %2, %4 : vector<8x128xf32>
    %cst_5 = arith.constant 0.000000e+00 : f32
    %6 = vector.broadcast %cst_5 : f32 to vector<8x128xf32>
    %7 = arith.maximumf %5, %6 : vector<8x128xf32>
    %c0_6 = arith.constant 0 : index
    %c0_7 = arith.constant 0 : index
    %8 = vector.load %arg3[%c0_6, %c0_7] : memref<128x128xf32, #tpu.memory_space<vmem>>, vector<128x128xf32>
    %cst_8 = arith.constant dense<0.000000e+00> : vector<8x128xf32>
    %9 = tpu.matmul %7, %8, %cst_8 {dimension_numbers = #tpu.dot_dimension_numbers<[1], [0], [0], [1], [0, 0, 1, 1], [], []>} : vector<8x128xf32>, vector<128x128xf32>, vector<8x128xf32> -> vector<8x128xf32>
    %c1 = arith.constant 1 : index
    %c0_9 = arith.constant 0 : index
    %10 = vector.load %arg5[%c1, %c0_9] : memref<3x128xf32, #tpu.memory_space<vmem>>, vector<1x128xf32>
    %11 = vector.broadcast %10 : vector<1x128xf32> to vector<8x128xf32>
    %12 = arith.addf %9, %11 : vector<8x128xf32>
    %cst_10 = arith.constant 0.000000e+00 : f32
    %13 = vector.broadcast %cst_10 : f32 to vector<8x128xf32>
    %14 = arith.maximumf %12, %13 : vector<8x128xf32>
    %c0_11 = arith.constant 0 : index
    %c0_12 = arith.constant 0 : index
    %15 = vector.load %arg4[%c0_11, %c0_12] : memref<128x8xf32, #tpu.memory_space<vmem>>, vector<128x8xf32>
    %cst_13 = arith.constant dense<0.000000e+00> : vector<8x8xf32>
    %16 = tpu.matmul %14, %15, %cst_13 {dimension_numbers = #tpu.dot_dimension_numbers<[1], [0], [0], [1], [0, 0, 1, 1], [], []>} : vector<8x128xf32>, vector<128x8xf32>, vector<8x8xf32> -> vector<8x8xf32>
    %c2 = arith.constant 2 : index
    %c0_14 = arith.constant 0 : index
    %17 = vector.load %arg5[%c2, %c0_14] : memref<3x128xf32, #tpu.memory_space<vmem>>, vector<1x8xf32>
    %18 = vector.broadcast %17 : vector<1x8xf32> to vector<8x8xf32>
    %19 = arith.addf %16, %18 : vector<8x8xf32>
    %c0_15 = arith.constant 0 : index
    %c0_16 = arith.constant 0 : index
    %20 = vector.load %arg6[%c0_15, %c0_16] : memref<8x8xf32, #tpu.memory_space<vmem>>, vector<8x8xf32>
    tpu.vector_store %arg6[%c0_15, %c0_16], %19 {strides = array<i32>} : memref<8x8xf32, #tpu.memory_space<vmem>>, vector<8x8xf32>,
    return
  }
  func.func @transform_0(%arg0: i32) -> (i32, i32) {
    %c0_i32 = arith.constant 0 : i32
    %c0_i32_0 = arith.constant 0 : i32
    return %arg0, %c0_i32 : i32, i32
  }
  func.func @transform_1(%arg0: i32) -> (i32, i32) {
    %c0_i32 = arith.constant 0 : i32
    %c0_i32_0 = arith.constant 0 : i32
    %c0_i32_1 = arith.constant 0 : i32
    return %c0_i32, %c0_i32_0 : i32, i32
  }
  func.func @transform_2(%arg0: i32) -> (i32, i32) {
    %c0_i32 = arith.constant 0 : i32
    %c0_i32_0 = arith.constant 0 : i32
    %c0_i32_1 = arith.constant 0 : i32
    return %c0_i32, %c0_i32_0 : i32, i32
  }
  func.func @transform_3(%arg0: i32) -> (i32, i32) {
    %c0_i32 = arith.constant 0 : i32
    %c0_i32_0 = arith.constant 0 : i32
    %c0_i32_1 = arith.constant 0 : i32
    return %c0_i32, %c0_i32_0 : i32, i32
  }
  func.func @transform_4(%arg0: i32) -> (i32, i32) {
    %c0_i32 = arith.constant 0 : i32
    %c0_i32_0 = arith.constant 0 : i32
    %c0_i32_1 = arith.constant 0 : i32
    return %c0_i32, %c0_i32_0 : i32, i32
  }
  func.func @transform_5(%arg0: i32) -> (i32, i32) {
    %c0_i32 = arith.constant 0 : i32
    %c0_i32_0 = arith.constant 0 : i32
    return %arg0, %c0_i32 : i32, i32
  }
}

</mosaic_0001>

<bundles_post_ra>
// kernel: forward.1
= control target key start
LH: loop header
LB: loop body
LE: loop exit
PB: predicated region body
PF: predicated region fallthrough
CT: control target
= control target key end

     0   :  { %10 = vsyncpa [#allocation3], 0  ;;  %s288_s0 = inlined_call_operand.vmem [shape: f32[8,16], index: 0, kind: input, shape index: {}]   ;;  %s289_s1 = inlined_call_operand.vmem [shape: f32[16,128], index: 1, kind: input, shape index: {}]   ;;  %s290_s2 = inlined_call_operand.hbm [shape: f32[128,128], index: 2, kind: input, shape index: {}]   ;;  %s291_s3 = inlined_call_operand.hbm [shape: f32[128,8], index: 3, kind: input, shape index: {}]   ;;  %s292_s4 = inlined_call_operand.vmem [shape: f32[3,128], index: 4, kind: input, shape index: {}]   ;;  %s293_s5 = inlined_call_operand.vmem [shape: f32[8,8], index: 5, kind: output, shape index: {}]  }
   0x1   :  { %s20_s20 = sshll.u32 %s290_s2, 4  ;;  %s21_s20 = int_to_ptr.hbm [resolvable:$true] %s20_s20 }
   0x2   :  { %11 = vsyncpa [#allocation5], 0  ;;  %s227_s21 = smov [#allocation2]   ;;  %s33_s25 = sshll.u32 %s291_s3, 4  ;;  %s34_s25 = int_to_ptr.hbm [resolvable:$true] %s33_s25 }
   0x3   :  { %s22_s22 = sshll.u32 %s227_s21, 4  ;;  %s228_s26 = smov 128   ;;  %s23_s22 = int_to_ptr.vmem [resolvable:$true] %s22_s22 }
   0x4   :  { %s229_s27 = smov 8   ;;  %s230_s28 = smov [#allocation4]  }
   0x5   :  { %28 = dma.hbm_to_vmem [thread:$0]  %s21_s20, 2048, %s23_s22, [#allocation3], %s228_s26, %s228_s26, %s229_s27  }
   0x6   :  { %s35_s29 = sshll.u32 %s230_s28, 4  ;;  %s36_s29 = int_to_ptr.vmem [resolvable:$true] %s35_s29 }
   0x7   :  { %41 = dma.hbm_to_vmem [thread:$0]  %s34_s25, 2048, %s36_s29, [#allocation5], %s228_s26, %s228_s26, %s229_s27  }
   0x8   :  { %223 = dma.done.wait [#allocation3], 2048  }
   0x9   :  { %224 = vsyncadd [#allocation3], 4294965248 }
   0xa   :  { %225 = dma.done.wait [#allocation5], 2048  }
   0xb   :  { %226 = vsyncadd [#allocation5], 4294965248  ;;  %v54_v0 = vld [vmem:[%s289_s1 + $0x8] sm:$0xff]  ;;  %v53_v1 = vld [vmem:[%s289_s1] sm:$0xff]  ;;  %vm57_vm0 = vcmask 130048   ;;  %vm159_vm1 = vcmask 64512  }
   0xc   :  { %75 = vmatpush.msra.mxu0 %v54_v0  ;;  %v52_v2 = vld [vmem:[%s288_s0] sm:$0xff]  ;;  %v97_v3 = vld [vmem:[#allocation2 + $0x78] sm:$0xff]  ;;  %v96_v4 = vld [vmem:[#allocation2 + $0x70] sm:$0xff] }
   0xd   :  { %100 = vmatpush.msra.mxu1 %v97_v3  ;;  %v95_v5 = vld [vmem:[#allocation2 + $0x68] sm:$0xff]  ;;  %v94_v6 = vld [vmem:[#allocation2 + $0x60] sm:$0xff]  ;;  %v93_v7 = vld [vmem:[#allocation2 + $0x58] sm:$0xff] }
   0xe   :  { %76 = vmatpush.msra.mxu0 %v53_v1  ;;  %v92_v8 = vld [vmem:[#allocation2 + $0x50] sm:$0xff]  ;;  %v91_v9 = vld [vmem:[#allocation2 + $0x48] sm:$0xff]  ;;  %v90_v10 = vld [vmem:[#allocation2 + $0x40] sm:$0xff] }
   0xf   :  { %167 = vmatmul.msk.f32.vlgmr.msra.gmra.mxu0 %vm57_vm0, %v52_v2  ;;  %101 = vmatpush.msra.mxu1 %v96_v4  ;;  %v89_v11 = vld [vmem:[#allocation2 + $0x38] sm:$0xff]  ;;  %v88_v12 = vld [vmem:[#allocation2 + $0x30] sm:$0xff]  ;;  %v87_v13 = vld [vmem:[#allocation2 + $0x28] sm:$0xff] }
  0x10   :  { %v86_v14 = vld [vmem:[#allocation2 + $0x20] sm:$0xff]  ;;  %v85_v15 = vld [vmem:[#allocation2 + $0x18] sm:$0xff]  ;;  %v84_v16 = vld [vmem:[#allocation2 + $0x10] sm:$0xff] }
  0x11   :  { %102 = vmatpush.msra.mxu1 %v95_v5  ;;  %v83_v17 = vld [vmem:[#allocation2 + $0x8] sm:$0xff]  ;;  %v82_v18 = vld [vmem:[#allocation2] sm:$0xff]  ;;  %v136_v19 = vld [vmem:[#allocation4 + $0x78] sm:$0xff] }
  0x12   :  { %v135_v20 = vld [vmem:[#allocation4 + $0x70] sm:$0xff]  ;;  %139 = vmatpush.msra.mxu2 %v136_v19  ;;  %v134_v21 = vld [vmem:[#allocation4 + $0x68] sm:$0xff]  ;;  %v133_v22 = vld [vmem:[#allocation4 + $0x60] sm:$0xff] }
  0x13   :  { %103 = vmatpush.msra.mxu1 %v94_v6  ;;  %v132_v23 = vld [vmem:[#allocation4 + $0x58] sm:$0xff]  ;;  %v131_v24 = vld [vmem:[#allocation4 + $0x50] sm:$0xff]  ;;  %v130_v25 = vld [vmem:[#allocation4 + $0x48] sm:$0xff] }
  0x14   :  { %140 = vmatpush.msra.mxu2 %v135_v20  ;;  %v129_v26 = vld [vmem:[#allocation4 + $0x40] sm:$0xff]  ;;  %v128_v27 = vld [vmem:[#allocation4 + $0x38] sm:$0xff]  ;;  %v127_v28 = vld [vmem:[#allocation4 + $0x30] sm:$0xff] }
  0x15   :  { %104 = vmatpush.msra.mxu1 %v93_v7  ;;  %v126_v29 = vld [vmem:[#allocation4 + $0x28] sm:$0xff]  ;;  %v125_v30 = vld [vmem:[#allocation4 + $0x20] sm:$0xff]  ;;  %v124_v31 = vld [vmem:[#allocation4 + $0x18] sm:$0xff] }
  0x16   :  { %141 = vmatpush.msra.mxu2 %v134_v21  ;;  %v172_v32 = vld [vmem:[%s292_s4] ss:$0 sm:$0xff]  ;;  %v123_v36 = vld [vmem:[#allocation4 + $0x10] sm:$0xff]  ;;  %v122_v37 = vld [vmem:[#allocation4 + $0x8] sm:$0xff] }
  0x17   :  { %105 = vmatpush.msra.mxu1 %v92_v8  ;;  %v121_v38 = vld [vmem:[#allocation4] sm:$0xff] }
  0x18   :  { %142 = vmatpush.msra.mxu2 %v133_v22  ;;  %v173_v39 = vld [vmem:[%s292_s4 + $0x1] ss:$0 sm:$0xff]  ;;  %v174_v43 = vld [vmem:[%s292_s4 + $0x2] ss:$0 sm:$0xff] }
  0x19   :  { %106 = vmatpush.msra.mxu1 %v91_v9 }
  0x1a   :  { %143 = vmatpush.msra.mxu2 %v132_v23 }
  0x1b   :  { %107 = vmatpush.msra.mxu1 %v90_v10 }
  0x1c   :  { %144 = vmatpush.msra.mxu2 %v131_v24 }
  0x1d   :  { %108 = vmatpush.msra.mxu1 %v89_v11 }
  0x1e   :  { %145 = vmatpush.msra.mxu2 %v130_v25 }
  0x1f   :  { %109 = vmatpush.msra.mxu1 %v88_v12 }
  0x20   :  { %146 = vmatpush.msra.mxu2 %v129_v26 }
  0x21   :  { %110 = vmatpush.msra.mxu1 %v87_v13 }
  0x22   :  { %147 = vmatpush.msra.mxu2 %v128_v27 }
  0x23   :  { %111 = vmatpush.msra.mxu1 %v86_v14 }
  0x24   :  { %148 = vmatpush.msra.mxu2 %v127_v28 }
  0x25   :  { %112 = vmatpush.msra.mxu1 %v85_v15 }
  0x26   :  { %149 = vmatpush.msra.mxu2 %v126_v29 }
  0x27   :  { %113 = vmatpush.msra.mxu1 %v84_v16 }
  0x28   :  { %150 = vmatpush.msra.mxu2 %v125_v30 }
  0x29   :  { %114 = vmatpush.msra.mxu1 %v83_v17 }
  0x2a   :  { %151 = vmatpush.msra.mxu2 %v124_v31 }
  0x2b   :  { %115 = vmatpush.msra.mxu1 %v82_v18 }
  0x2c   :  { %152 = vmatpush.msra.mxu2 %v123_v36 }
  0x2e   :  { %153 = vmatpush.msra.mxu2 %v122_v37 }
  0x30   :  { %154 = vmatpush.msra.mxu2 %v121_v38 }
  0x8c   :  { %v78_v33 = vpop.f32.mrf.mxu0 }
  0x8d   :  { %v79_v34 = vadd.f32 %v172_v32, %v78_v33 }
  0x8f   :  { %v81_v35 = vmax.f32 %v79_v34, 0.0 }
  0x91   :  { %116 = vmatmul.f32.vlgmr.msra.gmra.mxu1 %v81_v35 }
 0x10e   :  { %v117_v40 = vpop.f32.mrf.mxu1 }
 0x10f   :  { %v118_v41 = vadd.f32 %v173_v39, %v117_v40 }
 0x111   :  { %v120_v42 = vmax.f32 %v118_v41, 0.0 }
 0x113   :  { %155 = vmatmul.f32.vlgmr.msra.gmra.mxu2 %v120_v42 }
 0x196   :  { %v156_v44 = vpop.f32.mrf.mxu2 }
 0x197   :  { %v157_v45 = vadd.f32 %v174_v43, %v156_v44 }
 0x199   :  { %160 = vst.msk [vmem:[%s293_s5] sm:$0xff] %vm159_vm1, %v157_v45 }
 0x19a   :  { %165 = vsyncpa [#allocation3], 1 }
 0x19b   :  { %166 = vsyncpa [#allocation5], 1 }

</bundles_post_ra>
